<compile_context>
chip_gen: v6e
topology: v6e:2x2x1
jax: 0.10.0
libtpu: 0.0.40
codegen_flags: <defaults>
</compile_context>

<pallas_src>
import functools
import math

import jax
import jax.numpy as jnp
from jax import lax
from jax.experimental import pallas as pl
from jax.experimental.pallas import tpu as pltpu

_SELU_ALPHA = 1.6732632423543772
_SELU_SCALE = 1.0507009873554805


def _selu_unscaled(x):
    # SELU without the outer scale (the scale is folded into the next Linear's
    # weights).  exp(x)-1 instead of expm1: precision delta << bf16 matmul noise.
    return jnp.where(x > 0, x, _SELU_ALPHA * (jnp.exp(x) - 1.0))


def _stable_softplus(z):
    # log(1 + exp(z)) without overflow for large |z| (matches torch softplus,
    # which switches to the linear branch for large inputs).
    return jnp.maximum(z, 0.0) + jnp.log(1.0 + jnp.exp(-jnp.abs(z)))


def _mlp_kernel(x_ref, w1_ref, b1_ref, w2_ref, b2_ref, w3_ref, b3_ref,
                w4_ref, b4_ref, o_ref, *, clamp_to, soft_clamp, exp_final,
                act_dtype):
    # x_ref : (tile_m, in_dim) f32 -- untransposed batch block.
    # wN_ref: (out_f, in_f) bf16 (PyTorch Linear layout, SELU scale pre-folded
    #         into w2/w3/w4); bN_ref: (out_f, 1) f32.
    x = x_ref[...].astype(jnp.bfloat16)                       # (tile_m, in_dim)

    # Layer 1: NT contraction (contract dim 1 of both operands) -> the result is
    # already lane-dense (hidden, tile_m); no wrapper-side transpose of x needed.
    h = lax.dot_general(w1_ref[...], x, (((1,), (1,)), ((), ())),
                        preferred_element_type=jnp.float32) + b1_ref[...]
    h = _selu_unscaled(h.astype(act_dtype))
    h = jnp.dot(w2_ref[...], h.astype(jnp.bfloat16),
                preferred_element_type=jnp.float32) + b2_ref[...]
    h = _selu_unscaled(h.astype(act_dtype))
    h = jnp.dot(w3_ref[...], h.astype(jnp.bfloat16),
                preferred_element_type=jnp.float32) + b3_ref[...]
    h = _selu_unscaled(h.astype(act_dtype))
    out = jnp.dot(w4_ref[...], h.astype(jnp.bfloat16),
                  preferred_element_type=jnp.float32) + b4_ref[...]

    if clamp_to is not None:
        if soft_clamp:
            # torch.nn.functional.softplus(out, beta=1/clamp_to), stable form.
            beta = 1.0 / clamp_to
            out = clamp_to * _stable_softplus(beta * out)
        else:
            out = jnp.maximum(out, clamp_to)   # torch clamp(min=clamp_to)
    if exp_final:
        out = jnp.exp(out)

    o_ref[...] = out.astype(o_ref.dtype)


def _round_up(a, b):
    return ((a + b - 1) // b) * b


@functools.partial(
    jax.jit,
    static_argnames=("tile_m", "out_dim", "clamp_to", "soft_clamp",
                     "exp_final", "act_bf16"))
def _mlp_forward(x2d, params, *, tile_m, out_dim, clamp_to, soft_clamp,
                 exp_final, act_bf16):
    """x2d: (n, in_dim) f32  ->  (n, out_dim) f32."""
    w1 = params[0]
    n, in_dim = x2d.shape
    hidden = w1.shape[0]

    grid = (pl.cdiv(n, tile_m),)          # ragged last tile handled by Pallas
    act_dtype = jnp.bfloat16 if act_bf16 else jnp.float32
    kernel = functools.partial(_mlp_kernel, clamp_to=clamp_to,
                               soft_clamp=soft_clamp, exp_final=exp_final,
                               act_dtype=act_dtype)

    flops = 2 * n * (in_dim * hidden + 2 * hidden * hidden + hidden * out_dim)
    transcendentals = 3 * n * hidden + (
        n * out_dim if (exp_final or (clamp_to is not None and soft_clamp)) else 0)
    bytes_accessed = (n * in_dim * 4 + n * out_dim * 4
                      + sum(int(p.size) * p.dtype.itemsize for p in params))

    out_t = pl.pallas_call(
        kernel,
        out_shape=jax.ShapeDtypeStruct((out_dim, n), jnp.float32),
        grid=grid,
        in_specs=[pl.BlockSpec((tile_m, in_dim), lambda i: (i, 0))]
                 + [pl.BlockSpec(p.shape, lambda i: (0, 0)) for p in params],
        out_specs=pl.BlockSpec((out_dim, tile_m), lambda i: (0, i)),
        compiler_params=pltpu.CompilerParams(
            dimension_semantics=("parallel",)),
        cost_estimate=pl.CostEstimate(flops=flops,
                                      transcendentals=transcendentals,
                                      bytes_accessed=bytes_accessed),
    )(x2d, *params)

    # Output-side transpose is cheap (out_dim << n) and keeps in-kernel stores
    # lane-dense.
    return out_t.T


def _init_linear(key, fan_in, fan_out):
    # torch.nn.Linear default init: U(-1/sqrt(fan_in), 1/sqrt(fan_in)).
    kw, kb = jax.random.split(key)
    bound = 1.0 / math.sqrt(fan_in)
    w = jax.random.uniform(kw, (fan_out, fan_in), jnp.float32, -bound, bound)
    b = jax.random.uniform(kb, (fan_out,), jnp.float32, -bound, bound)
    return w, b


class MLPPallas:
    """JAX/Pallas port of the PyTorch MLP module (forward pass)."""

    def __init__(self, dim, out_dim=None, w=64, time_varying=False,
                 time_embedding=False, clamp_to=None, soft_clamp=False,
                 exp_final=False, key=jax.random.PRNGKey(0)):
        self.dim = dim
        self.time_varying = time_varying
        self.time_embedding = time_embedding
        if out_dim is None:
            out_dim = dim
        self.out_dim = out_dim
        if time_varying:
            if not time_embedding:
                maybe_time_dim = 1
            else:
                self.half_t_embed_dim = dim
                maybe_time_dim = self.half_t_embed_dim * 2
        else:
            maybe_time_dim = 0
        self.in_dim = dim + maybe_time_dim
        self.w = w
        self.clamp_output_to = clamp_to
        self.soft_clamp = soft_clamp
        self.exp_final = exp_final

        # Generation-aware knobs.
        kind = ""
        try:
            kind = jax.devices()[0].device_kind.lower()
        except Exception:
            pass
        self._act_bf16 = ("v6" in kind) or ("v7" in kind)   # bf16 VPU/EUP path
        self._tile_cap = 2048 if "v5" in kind else 4096      # scoped-VMEM aware
        self._two_tc = "v7" in kind                           # 2 TCs per chip

        keys = jax.random.split(key, 4)
        dims = [(self.in_dim, w), (w, w), (w, w), (w, out_dim)]
        (w1, b1), (w2, b2), (w3, b3), (w4, b4) = [
            _init_linear(k, fi, fo) for k, (fi, fo) in zip(keys, dims)]
        # Fold the SELU output scale into the consumers of the SELU outputs:
        #   scale * f(h) @ W.T == f(h) @ (scale * W).T
        w2 = w2 * _SELU_SCALE
        w3 = w3 * _SELU_SCALE
        w4 = w4 * _SELU_SCALE
        # Weights as bf16 (MXU operands, halves weight DMA); biases stay f32,
        # shaped (out_f, 1) so they broadcast over the lane (batch) axis.
        self.params = (w1.astype(jnp.bfloat16), b1.reshape(-1, 1),
                       w2.astype(jnp.bfloat16), b2.reshape(-1, 1),
                       w3.astype(jnp.bfloat16), b3.reshape(-1, 1),
                       w4.astype(jnp.bfloat16), b4.reshape(-1, 1))

    def _time_embedder(self, t):
        freq = jnp.arange(self.half_t_embed_dim, dtype=jnp.float32)
        t = t * jnp.exp(-freq * jnp.log(10000.0) / self.half_t_embed_dim)
        return jnp.concatenate([jnp.sin(t), jnp.cos(t)], axis=-1)

    def __call__(self, x):
        orig_batch_shape = x.shape[:-1]
        if self.time_embedding:
            # Tiny elementwise glue kept in plain JAX (layout plumbing).
            t = self._time_embedder(x[..., -1:])
            x = jnp.concatenate([x[..., :-1], t], axis=-1)
        x2d = x.reshape(-1, x.shape[-1]).astype(jnp.float32)
        n = x2d.shape[0]
        # Batch tile: multiple of 128, capped per generation; on 2-TC chips keep
        # the parallel grid at >= 2 steps so both TensorCores get work.
        if self._two_tc:
            target = _round_up(max(-(-n // 2), 1), 128)
        else:
            target = _round_up(max(n, 1), 128)
        tile_m = max(128, min(self._tile_cap, target))
        out = _mlp_forward(
            x2d, self.params, tile_m=tile_m, out_dim=self.out_dim,
            clamp_to=self.clamp_output_to, soft_clamp=self.soft_clamp,
            exp_final=self.exp_final, act_bf16=self._act_bf16)
        return out.reshape(*orig_batch_shape, self.out_dim)


def _reference(mlp, x):
    # Pure-JAX reference mirroring the kernel math (bf16 matmul operands, f32
    # accumulation, folded SELU scale, same activation dtype) in the standard
    # (batch, features) orientation.
    if mlp.time_embedding:
        t = mlp._time_embedder(x[..., -1:])
        x = jnp.concatenate([x[..., :-1], t], axis=-1)
    w1, b1, w2, b2, w3, b3, w4, b4 = mlp.params
    act_dtype = jnp.bfloat16 if mlp._act_bf16 else jnp.float32
    batch_shape = x.shape[:-1]
    h = x.reshape(-1, x.shape[-1]).astype(jnp.bfloat16)
    for wi, bi in ((w1, b1), (w2, b2), (w3, b3)):
        h = jnp.dot(h, wi.T, preferred_element_type=jnp.float32) + bi.reshape(1, -1)
        h = _selu_unscaled(h.astype(act_dtype)).astype(jnp.bfloat16)
    out = jnp.dot(h, w4.T, preferred_element_type=jnp.float32) + b4.reshape(1, -1)
    if mlp.clamp_output_to is not None:
        if mlp.soft_clamp:
            beta = 1.0 / mlp.clamp_output_to
            out = mlp.clamp_output_to * _stable_softplus(beta * out)
        else:
            out = jnp.maximum(out, mlp.clamp_output_to)
    if mlp.exp_final:
        out = jnp.exp(out)
    return out.reshape(*batch_shape, -1)


if __name__ == "__main__":
    key = jax.random.PRNGKey(0)
    k_param, k_param2, k_x, k_x2 = jax.random.split(key, 4)

    batch, dim, hidden = 8, 8, 64

    # Test 1: plain MLP (exercises the ragged/partial last-tile path: n=8 < 128).
    mlp = MLPPallas(dim=dim, w=hidden, key=k_param)
    x = jax.random.normal(k_x, (batch, dim), dtype=jnp.float32)
    out = mlp(x)
    jax.block_until_ready(out)
    ref = _reference(mlp, x)
    assert out.shape == (batch, dim)
    assert jnp.allclose(out, ref, atol=5e-3, rtol=5e-3), "mismatch vs reference (plain)"

    # Test 2: time-varying + time-embedding + soft-clamp + exp_final epilogue.
    mlp2 = MLPPallas(dim=dim, w=hidden, out_dim=4, time_varying=True,
                     time_embedding=True, clamp_to=5.0, soft_clamp=True,
                     exp_final=True, key=k_param2)
    x2 = jax.random.normal(k_x2, (batch, dim + 1), dtype=jnp.float32)
    out2 = mlp2(x2)
    jax.block_until_ready(out2)
    ref2 = _reference(mlp2, x2)
    assert out2.shape == (batch, 4)
    assert jnp.allclose(out2, ref2, atol=5e-3, rtol=5e-3), "mismatch vs reference (epilogue)"

    print("KERNEL_OK")
</pallas_src>

<mosaic_0001>
module attributes {stable_mosaic.version = 11 : i64} {
  func.func @_mlp_kernel(%arg0: i32, %arg1: memref<128x8xf32, #tpu.memory_space<vmem>>, %arg2: memref<64x8xbf16, #tpu.memory_space<vmem>>, %arg3: memref<64x1xf32, #tpu.memory_space<vmem>>, %arg4: memref<64x64xbf16, #tpu.memory_space<vmem>>, %arg5: memref<64x1xf32, #tpu.memory_space<vmem>>, %arg6: memref<64x64xbf16, #tpu.memory_space<vmem>>, %arg7: memref<64x1xf32, #tpu.memory_space<vmem>>, %arg8: memref<8x64xbf16, #tpu.memory_space<vmem>>, %arg9: memref<8x1xf32, #tpu.memory_space<vmem>>, %arg10: memref<8x128xf32, #tpu.memory_space<vmem>>) attributes {dimension_semantics = [#tpu.dimension_semantics<parallel>], iteration_bounds = array<i64: 1>, scalar_prefetch = 0 : i64, scratch_operands = 0 : i64, tpu.core_type = #tpu.core_type<tc>, window_params = [{transform_indices = @transform_0, window_bounds = array<i64: 128, 8>}, {pipeline_mode = #tpu.pipeline_mode<synchronous>, transform_indices = @transform_1, window_bounds = array<i64: 64, 8>}, {pipeline_mode = #tpu.pipeline_mode<synchronous>, transform_indices = @transform_2, window_bounds = array<i64: 64, 1>}, {pipeline_mode = #tpu.pipeline_mode<synchronous>, transform_indices = @transform_3, window_bounds = array<i64: 64, 64>}, {pipeline_mode = #tpu.pipeline_mode<synchronous>, transform_indices = @transform_4, window_bounds = array<i64: 64, 1>}, {pipeline_mode = #tpu.pipeline_mode<synchronous>, transform_indices = @transform_5, window_bounds = array<i64: 64, 64>}, {pipeline_mode = #tpu.pipeline_mode<synchronous>, transform_indices = @transform_6, window_bounds = array<i64: 64, 1>}, {pipeline_mode = #tpu.pipeline_mode<synchronous>, transform_indices = @transform_7, window_bounds = array<i64: 8, 64>}, {pipeline_mode = #tpu.pipeline_mode<synchronous>, transform_indices = @transform_8, window_bounds = array<i64: 8, 1>}, {transform_indices = @transform_9, window_bounds = array<i64: 8, 128>}]} {
    %c0 = arith.constant 0 : index
    %c0_0 = arith.constant 0 : index
    %0 = vector.load %arg1[%c0, %c0_0] : memref<128x8xf32, #tpu.memory_space<vmem>>, vector<128x8xf32>
    %1 = arith.truncf %0 : vector<128x8xf32> to vector<128x8xbf16>
    %c0_1 = arith.constant 0 : index
    %c0_2 = arith.constant 0 : index
    %2 = vector.load %arg2[%c0_1, %c0_2] : memref<64x8xbf16, #tpu.memory_space<vmem>>, vector<64x8xbf16>
    %cst = arith.constant dense<0.000000e+00> : vector<64x128xf32>
    %3 = tpu.matmul %2, %1, %cst {dimension_numbers = #tpu.dot_dimension_numbers<[1], [1], [0], [0], [0, 0, 1, 0], [], []>} : vector<64x8xbf16>, vector<128x8xbf16>, vector<64x128xf32> -> vector<64x128xf32>
    %c0_3 = arith.constant 0 : index
    %c0_4 = arith.constant 0 : index
    %4 = vector.load %arg3[%c0_3, %c0_4] : memref<64x1xf32, #tpu.memory_space<vmem>>, vector<64x1xf32>
    %5 = vector.broadcast %4 : vector<64x1xf32> to vector<64x128xf32>
    %6 = arith.addf %3, %5 : vector<64x128xf32>
    %cst_5 = arith.constant 0.000000e+00 : f32
    %7 = vector.broadcast %cst_5 : f32 to vector<64x128xf32>
    %8 = arith.cmpf ogt, %6, %7 : vector<64x128xf32>
    %9 = math.exp %6 : vector<64x128xf32>
    %cst_6 = arith.constant 1.000000e+00 : f32
    %10 = vector.broadcast %cst_6 : f32 to vector<64x128xf32>
    %11 = arith.subf %9, %10 : vector<64x128xf32>
    %cst_7 = arith.constant 1.67326319 : f32
    %12 = vector.broadcast %cst_7 : f32 to vector<64x128xf32>
    %13 = arith.mulf %12, %11 : vector<64x128xf32>
    %14 = arith.select %8, %6, %13 : vector<64x128xi1>, vector<64x128xf32>
    %c0_8 = arith.constant 0 : index
    %c0_9 = arith.constant 0 : index
    %15 = vector.load %arg4[%c0_8, %c0_9] : memref<64x64xbf16, #tpu.memory_space<vmem>>, vector<64x64xbf16>
    %16 = arith.truncf %14 : vector<64x128xf32> to vector<64x128xbf16>
    %cst_10 = arith.constant dense<0.000000e+00> : vector<64x128xf32>
    %17 = tpu.matmul %15, %16, %cst_10 {dimension_numbers = #tpu.dot_dimension_numbers<[1], [0], [0], [1], [0, 0, 1, 1], [], []>} : vector<64x64xbf16>, vector<64x128xbf16>, vector<64x128xf32> -> vector<64x128xf32>
    %c0_11 = arith.constant 0 : index
    %c0_12 = arith.constant 0 : index
    %18 = vector.load %arg5[%c0_11, %c0_12] : memref<64x1xf32, #tpu.memory_space<vmem>>, vector<64x1xf32>
    %19 = vector.broadcast %18 : vector<64x1xf32> to vector<64x128xf32>
    %20 = arith.addf %17, %19 : vector<64x128xf32>
    %cst_13 = arith.constant 0.000000e+00 : f32
    %21 = vector.broadcast %cst_13 : f32 to vector<64x128xf32>
    %22 = arith.cmpf ogt, %20, %21 : vector<64x128xf32>
    %23 = math.exp %20 : vector<64x128xf32>
    %cst_14 = arith.constant 1.000000e+00 : f32
    %24 = vector.broadcast %cst_14 : f32 to vector<64x128xf32>
    %25 = arith.subf %23, %24 : vector<64x128xf32>
    %cst_15 = arith.constant 1.67326319 : f32
    %26 = vector.broadcast %cst_15 : f32 to vector<64x128xf32>
    %27 = arith.mulf %26, %25 : vector<64x128xf32>
    %28 = arith.select %22, %20, %27 : vector<64x128xi1>, vector<64x128xf32>
    %c0_16 = arith.constant 0 : index
    %c0_17 = arith.constant 0 : index
    %29 = vector.load %arg6[%c0_16, %c0_17] : memref<64x64xbf16, #tpu.memory_space<vmem>>, vector<64x64xbf16>
    %30 = arith.truncf %28 : vector<64x128xf32> to vector<64x128xbf16>
    %cst_18 = arith.constant dense<0.000000e+00> : vector<64x128xf32>
    %31 = tpu.matmul %29, %30, %cst_18 {dimension_numbers = #tpu.dot_dimension_numbers<[1], [0], [0], [1], [0, 0, 1, 1], [], []>} : vector<64x64xbf16>, vector<64x128xbf16>, vector<64x128xf32> -> vector<64x128xf32>
    %c0_19 = arith.constant 0 : index
    %c0_20 = arith.constant 0 : index
    %32 = vector.load %arg7[%c0_19, %c0_20] : memref<64x1xf32, #tpu.memory_space<vmem>>, vector<64x1xf32>
    %33 = vector.broadcast %32 : vector<64x1xf32> to vector<64x128xf32>
    %34 = arith.addf %31, %33 : vector<64x128xf32>
    %cst_21 = arith.constant 0.000000e+00 : f32
    %35 = vector.broadcast %cst_21 : f32 to vector<64x128xf32>
    %36 = arith.cmpf ogt, %34, %35 : vector<64x128xf32>
    %37 = math.exp %34 : vector<64x128xf32>
    %cst_22 = arith.constant 1.000000e+00 : f32
    %38 = vector.broadcast %cst_22 : f32 to vector<64x128xf32>
    %39 = arith.subf %37, %38 : vector<64x128xf32>
    %cst_23 = arith.constant 1.67326319 : f32
    %40 = vector.broadcast %cst_23 : f32 to vector<64x128xf32>
    %41 = arith.mulf %40, %39 : vector<64x128xf32>
    %42 = arith.select %36, %34, %41 : vector<64x128xi1>, vector<64x128xf32>
    %c0_24 = arith.constant 0 : index
    %c0_25 = arith.constant 0 : index
    %43 = vector.load %arg8[%c0_24, %c0_25] : memref<8x64xbf16, #tpu.memory_space<vmem>>, vector<8x64xbf16>
    %44 = arith.truncf %42 : vector<64x128xf32> to vector<64x128xbf16>
    %cst_26 = arith.constant dense<0.000000e+00> : vector<8x128xf32>
    %45 = tpu.matmul %43, %44, %cst_26 {dimension_numbers = #tpu.dot_dimension_numbers<[1], [0], [0], [1], [0, 0, 1, 1], [], []>} : vector<8x64xbf16>, vector<64x128xbf16>, vector<8x128xf32> -> vector<8x128xf32>
    %c0_27 = arith.constant 0 : index
    %c0_28 = arith.constant 0 : index
    %46 = vector.load %arg9[%c0_27, %c0_28] : memref<8x1xf32, #tpu.memory_space<vmem>>, vector<8x1xf32>
    %47 = vector.broadcast %46 : vector<8x1xf32> to vector<8x128xf32>
    %48 = arith.addf %45, %47 : vector<8x128xf32>
    %c0_29 = arith.constant 0 : index
    %c0_30 = arith.constant 0 : index
    %49 = vector.load %arg10[%c0_29, %c0_30] : memref<8x128xf32, #tpu.memory_space<vmem>>, vector<8x128xf32>
    tpu.vector_store %arg10[%c0_29, %c0_30], %48 {strides = array<i32>} : memref<8x128xf32, #tpu.memory_space<vmem>>, vector<8x128xf32>,
    return
  }
  func.func @transform_0(%arg0: i32) -> (i32, i32) {
    %c0_i32 = arith.constant 0 : i32
    %c0_i32_0 = arith.constant 0 : i32
    return %arg0, %c0_i32 : i32, i32
  }
  func.func @transform_1(%arg0: i32) -> (i32, i32) {
    %c0_i32 = arith.constant 0 : i32
    %c0_i32_0 = arith.constant 0 : i32
    %c0_i32_1 = arith.constant 0 : i32
    return %c0_i32, %c0_i32_0 : i32, i32
  }
  func.func @transform_2(%arg0: i32) -> (i32, i32) {
    %c0_i32 = arith.constant 0 : i32
    %c0_i32_0 = arith.constant 0 : i32
    %c0_i32_1 = arith.constant 0 : i32
    return %c0_i32, %c0_i32_0 : i32, i32
  }
  func.func @transform_3(%arg0: i32) -> (i32, i32) {
    %c0_i32 = arith.constant 0 : i32
    %c0_i32_0 = arith.constant 0 : i32
    %c0_i32_1 = arith.constant 0 : i32
    return %c0_i32, %c0_i32_0 : i32, i32
  }
  func.func @transform_4(%arg0: i32) -> (i32, i32) {
    %c0_i32 = arith.constant 0 : i32
    %c0_i32_0 = arith.constant 0 : i32
    %c0_i32_1 = arith.constant 0 : i32
    return %c0_i32, %c0_i32_0 : i32, i32
  }
  func.func @transform_5(%arg0: i32) -> (i32, i32) {
    %c0_i32 = arith.constant 0 : i32
    %c0_i32_0 = arith.constant 0 : i32
    %c0_i32_1 = arith.constant 0 : i32
    return %c0_i32, %c0_i32_0 : i32, i32
  }
  func.func @transform_6(%arg0: i32) -> (i32, i32) {
    %c0_i32 = arith.constant 0 : i32
    %c0_i32_0 = arith.constant 0 : i32
    %c0_i32_1 = arith.constant 0 : i32
    return %c0_i32, %c0_i32_0 : i32, i32
  }
  func.func @transform_7(%arg0: i32) -> (i32, i32) {
    %c0_i32 = arith.constant 0 : i32
    %c0_i32_0 = arith.constant 0 : i32
    %c0_i32_1 = arith.constant 0 : i32
    return %c0_i32, %c0_i32_0 : i32, i32
  }
  func.func @transform_8(%arg0: i32) -> (i32, i32) {
    %c0_i32 = arith.constant 0 : i32
    %c0_i32_0 = arith.constant 0 : i32
    %c0_i32_1 = arith.constant 0 : i32
    return %c0_i32, %c0_i32_0 : i32, i32
  }
  func.func @transform_9(%arg0: i32) -> (i32, i32) {
    %c0_i32 = arith.constant 0 : i32
    %c0_i32_0 = arith.constant 0 : i32
    return %c0_i32, %arg0 : i32, i32
  }
}

</mosaic_0001>

<bundles_post_ra>
// kernel: _mlp_forward.1
= control target key start
LH: loop header
LB: loop body
LE: loop exit
PB: predicated region body
PF: predicated region fallthrough
CT: control target
= control target key end

     0   :  { %vm133_vm0 = vcmask 64512   ;;  %v976_v3 = vmov 0   ;;  %vm363_vm1 = vcmask 523264   ;;  %s1283_s0 = inlined_call_operand.vmem [shape: f32[8,8], index: 0, kind: input, shape index: {}]   ;;  %s1284_s1 = inlined_call_operand.vmem [shape: bf16[64,8], index: 1, kind: input, shape index: {}]   ;;  %s1285_s2 = inlined_call_operand.vmem [shape: f32[64,1], index: 2, kind: input, shape index: {}]   ;;  %s1286_s4 = inlined_call_operand.vmem [shape: f32[64,1], index: 4, kind: input, shape index: {}]   ;;  %s1287_s6 = inlined_call_operand.vmem [shape: f32[64,1], index: 6, kind: input, shape index: {}]   ;;  %s1288_s8 = inlined_call_operand.vmem [shape: f32[8,1], index: 8, kind: input, shape index: {}]   ;;  %s1289_s3 = inlined_call_operand.vmem [shape: bf16[64,64], index: 3, kind: input, shape index: {}]   ;;  %s1290_s5 = inlined_call_operand.vmem [shape: bf16[64,64], index: 5, kind: input, shape index: {}]   ;;  %s1291_s7 = inlined_call_operand.vmem [shape: bf16[8,64], index: 7, kind: input, shape index: {}]   ;;  %s1292_s9 = inlined_call_operand.vmem [shape: f32[8,8], index: 9, kind: output, shape index: {}]  }
   0x1   :  { %v47_v0 = vld [vmem:[%s1283_s0 + $0x70] sm:$0xff]  ;;  %v48_v1 = vld [vmem:[%s1283_s0 + $0x78] sm:$0xff]  ;;  %v45_v2 = vld [vmem:[%s1283_s0 + $0x60] sm:$0xff]  ;;  %914 = vset.pattern.permute.xlu0 %v976_v3  ;;  %915 = vset.pattern.permute.xlu1 %v976_v3 }
   0x2   :  { %v56_v4 = vpack.c.bf16 %v48_v1, %v47_v0  ;;  %v46_v5 = vld [vmem:[%s1283_s0 + $0x68] sm:$0xff]  ;;  %v43_v8 = vld [vmem:[%s1283_s0 + $0x50] sm:$0xff]  ;;  %v44_v9 = vld [vmem:[%s1283_s0 + $0x58] sm:$0xff] }
   0x3   :  { %v55_v6 = vpack.c.bf16 %v46_v5, %v45_v2  ;;  %v916_v10 = vld [vmem:[%s1284_s1] sm:$0xff]   ;;  %v54_v12 = vpack.c.bf16 %v44_v9, %v43_v8  ;;  %v71_v13 = vld [vmem:[%s1285_s2 + $0x30] sm:$0xff]  ;;  %v72_v15 = vld [vmem:[%s1285_s2 + $0x38] sm:$0xff] }
   0x4   :  { %903 = vmatprep.subr.msk.bf16.mxu0 %vm133_vm0, %v56_v4  ;;  %v168_v7 = vsel %vm133_vm0, %v56_v4, 0  ;;  %851 = vmatprep.mubr.msk.bf16.mxu0 %vm133_vm0, %v916_v10  ;;  %v69_v14 = vld [vmem:[%s1285_s2 + $0x20] sm:$0xff]  ;;  %v70_v16 = vld [vmem:[%s1285_s2 + $0x28] sm:$0xff]  ;;  %v67_v19 = vld [vmem:[%s1285_s2 + $0x10] sm:$0xff] }
   0x5   :  { %836 = vmatpush3.bf16.xpose.msra.mxu0 %v168_v7  ;;  %v165_v11 = vsel %vm133_vm0, %v55_v6, 0  ;;  %105 = vperm.xlu0 %914, %v71_v13   ;;  %v41_v17 = vld [vmem:[%s1283_s0 + $0x40] sm:$0xff]  ;;  %v42_v18 = vld [vmem:[%s1283_s0 + $0x48] sm:$0xff]  ;;  %v68_v20 = vld [vmem:[%s1285_s2 + $0x18] sm:$0xff]  ;;  %v162_v21 = vsel %vm133_vm0, %v54_v12, 0 }
   0x6   :  { %904 = vmatprep.subr.msk.bf16.mxu0 %vm133_vm0, %v55_v6  ;;  %95 = vperm.xlu1 %915, %v69_v14   ;;  %v53_v22 = vpack.c.bf16 %v42_v18, %v41_v17  ;;  %v65_v23 = vld [vmem:[%s1285_s2] sm:$0xff]  ;;  %v66_v24 = vld [vmem:[%s1285_s2 + $0x8] sm:$0xff]  ;;  %v39_v25 = vld [vmem:[%s1283_s0 + $0x30] sm:$0xff] }
   0x7   :  { %v40_v26 = vld [vmem:[%s1283_s0 + $0x38] sm:$0xff]  ;;  %v301_v27 = vld [vmem:[%s1286_s4 + $0x30] sm:$0xff]  ;;  %v299_v31 = vld [vmem:[%s1286_s4 + $0x20] sm:$0xff] }
   0x8   :  { %v302_v28 = vld [vmem:[%s1286_s4 + $0x38] sm:$0xff]  ;;  %v159_v29 = vsel %vm133_vm0, %v53_v22, 0  ;;  %v52_v30 = vpack.c.bf16 %v40_v26, %v39_v25  ;;  %v300_v32 = vld [vmem:[%s1286_s4 + $0x28] sm:$0xff]  ;;  %v37_v33 = vld [vmem:[%s1283_s0 + $0x20] sm:$0xff] }
   0x9   :  { %110 = vperm.xlu0 %914, %v72_v15   ;;  %v38_v34 = vld [vmem:[%s1283_s0 + $0x28] sm:$0xff]  ;;  %v297_v35 = vld [vmem:[%s1286_s4 + $0x10] sm:$0xff]  ;;  %v298_v36 = vld [vmem:[%s1286_s4 + $0x18] sm:$0xff] }
   0xa   :  { %100 = vperm.xlu1 %915, %v70_v16   ;;  %v156_v37 = vsel %vm133_vm0, %v52_v30, 0  ;;  %v51_v38 = vpack.c.bf16 %v38_v34, %v37_v33  ;;  %v295_v39 = vld [vmem:[%s1286_s4] sm:$0xff]  ;;  %v296_v40 = vld [vmem:[%s1286_s4 + $0x8] sm:$0xff]  ;;  %v35_v41 = vld [vmem:[%s1283_s0 + $0x10] sm:$0xff] }
   0xb   :  { %v36_v42 = vld [vmem:[%s1283_s0 + $0x18] sm:$0xff]  ;;  %v507_v43 = vld [vmem:[%s1287_s6 + $0x30] sm:$0xff]  ;;  %v505_v47 = vld [vmem:[%s1287_s6 + $0x20] sm:$0xff] }
   0xc   :  { %v508_v44 = vld [vmem:[%s1287_s6 + $0x38] sm:$0xff]  ;;  %v153_v45 = vsel %vm133_vm0, %v51_v38, 0  ;;  %v50_v46 = vpack.c.bf16 %v36_v42, %v35_v41  ;;  %v506_v48 = vld [vmem:[%s1287_s6 + $0x28] sm:$0xff]  ;;  %v33_v49 = vld [vmem:[%s1283_s0] sm:$0xff] }
   0xd   :  { %838 = vmatpush3.bf16.xpose.msra.mxu0 %v165_v11  ;;  %85 = vperm.xlu0 %914, %v67_v19   ;;  %v34_v50 = vld [vmem:[%s1283_s0 + $0x8] sm:$0xff]  ;;  %v503_v51 = vld [vmem:[%s1287_s6 + $0x10] sm:$0xff]  ;;  %v504_v52 = vld [vmem:[%s1287_s6 + $0x18] sm:$0xff] }
   0xe   :  { %905 = vmatprep.subr.msk.bf16.mxu0 %vm133_vm0, %v54_v12  ;;  %90 = vperm.xlu1 %915, %v68_v20   ;;  %v150_v53 = vsel %vm133_vm0, %v50_v46, 0  ;;  %v49_v54 = vpack.c.bf16 %v34_v50, %v33_v49  ;;  %v501_v55 = vld [vmem:[%s1287_s6] sm:$0xff]  ;;  %v502_v56 = vld [vmem:[%s1287_s6 + $0x8] sm:$0xff]  ;;  %v918_v60 = vld [vmem:[%s1284_s1 + $0x10] sm:$0xff]  }
   0xf   :  { %v699_v57 = vld [vmem:[%s1288_s8] sm:$0xff]  ;;  %v917_v59 = vld [vmem:[%s1284_s1 + $0x8] sm:$0xff]   ;;  %v919_v61 = vld [vmem:[%s1284_s1 + $0x18] sm:$0xff]  }
  0x10   :  { %v147_v58 = vsel %vm133_vm0, %v49_v54, 0  ;;  %v920_v62 = vld [vmem:[%s1289_s3] sm:$0xff]  }
  0x11   :  { %75 = vperm.xlu0 %914, %v65_v23   ;;  %867 = vmatprep.mubr.msk.bf16.mxu1 %vm363_vm1, %v920_v62 }
  0x12   :  { %80 = vperm.xlu1 %915, %v66_v24  }
  0x15   :  { %840 = vmatpush3.bf16.xpose.msra.mxu0 %v162_v21  ;;  %335 = vperm.xlu0 %914, %v301_v27  }
  0x16   :  { %906 = vmatprep.subr.msk.bf16.mxu0 %vm133_vm0, %v53_v22  ;;  %340 = vperm.xlu1 %915, %v302_v28  }
  0x19   :  { %325 = vperm.xlu0 %914, %v299_v31  }
  0x1a   :  { %330 = vperm.xlu1 %915, %v300_v32  }
  0x1d   :  { %842 = vmatpush3.bf16.xpose.msra.mxu0 %v159_v29  ;;  %315 = vperm.xlu0 %914, %v297_v35  }
  0x1e   :  { %907 = vmatprep.subr.msk.bf16.mxu0 %vm133_vm0, %v52_v30  ;;  %320 = vperm.xlu1 %915, %v298_v36  }
  0x21   :  { %305 = vperm.xlu0 %914, %v295_v39  }
  0x22   :  { %310 = vperm.xlu1 %915, %v296_v40  }
  0x25   :  { %844 = vmatpush3.bf16.xpose.msra.mxu0 %v156_v37  ;;  %541 = vperm.xlu0 %914, %v507_v43  }
  0x26   :  { %908 = vmatprep.subr.msk.bf16.mxu0 %vm133_vm0, %v51_v38  ;;  %546 = vperm.xlu1 %915, %v508_v44  }
  0x29   :  { %531 = vperm.xlu0 %914, %v505_v47  }
  0x2a   :  { %536 = vperm.xlu1 %915, %v506_v48  }
  0x2d   :  { %846 = vmatpush3.bf16.xpose.msra.mxu0 %v153_v45  ;;  %521 = vperm.xlu0 %914, %v503_v51  }
  0x2e   :  { %909 = vmatprep.subr.msk.bf16.mxu0 %vm133_vm0, %v50_v46  ;;  %526 = vperm.xlu1 %915, %v504_v52  }
  0x31   :  { %511 = vperm.xlu0 %914, %v501_v55  }
  0x32   :  { %516 = vperm.xlu1 %915, %v502_v56  }
  0x35   :  { %848 = vmatpush3.bf16.xpose.msra.mxu0 %v150_v53  ;;  %702 = vperm.xlu0 %914, %v699_v57  }
  0x36   :  { %910 = vmatprep.subr.msk.bf16.mxu0 %vm133_vm0, %v49_v54 }
  0x3d   :  { %850 = vmatpush3.bf16.xpose.msra.mxu0 %v147_v58 }
  0x44   :  { %852 = vmatmul.mubr.msk.bf16.vlgmr.msra.gmra.mxu0 %vm133_vm0, %v917_v59 }
  0x45   :  { %855 = vmatprep.mubr.msk.bf16.mxu0 %vm133_vm0, %v918_v60 }
  0x4c   :  { %856 = vmatmul.mubr.msk.bf16.gmra.mxu0 %vm133_vm0, %v919_v61 }
  0x80   :  { %v106_v0 = vpop.permute.xlu0 %105 }
  0x81   :  { %v96_v63 = vpop.permute.xlu1 %95 }
  0x84   :  { %v111_v2 = vpop.permute.xlu0 %110 }
  0x85   :  { %v101_v1 = vpop.permute.xlu1 %100 }
  0x88   :  { %v86_v7 = vpop.permute.xlu0 %85 }
  0x89   :  { %v91_v5 = vpop.permute.xlu1 %90 }
  0x8c   :  { %v76_v19 = vpop.permute.xlu0 %75 }
  0x8d   :  { %v81_v12 = vpop.permute.xlu1 %80 }
 0x104   :  { %v853_v3 = vpop.f32.mrf.mxu0 }
 0x105   :  { %v1190_v10 = vadd.f32 %v853_v3, %v86_v7  ;;  %v921_v3 = vld [vmem:[%s1289_s3 + $0x8] sm:$0xff]   ;;  %v341_v7 = vpop.permute.xlu1 %340 }
 0x106   :  { %v204_v4 = vpop.f32.mrf.mxu0 }
 0x107   :  { %v247_v20 = vmul.f32 1.442695, %v1190_v10  ;;  %v1196_v22 = vadd.f32 %v204_v4, %v76_v19  ;;  %vm237_vm7 = vcmp.gt.f32.partialorder %v1190_v10, 0.0  ;;  %v922_v4 = vld [vmem:[%s1289_s3 + $0x10] sm:$0xff]  }
 0x108   :  { %v854_v6 = vpop.f32.mrf.mxu0 }
 0x109   :  { %v1188_v8 = vadd.f32 %v854_v6, %v91_v5  ;;  %v243_v29 = vmul.f32 1.442695, %v1196_v22  ;;  %vm235_vm9 = vcmp.gt.f32.partialorder %v1196_v22, 0.0  ;;  %v923_v5 = vld [vmem:[%s1289_s3 + $0x18] sm:$0xff]   ;;  %v924_v6 = vld [vmem:[%s1290_s5] sm:$0xff]  }
 0x10a   :  { %v207_v9 = vpop.f32.mrf.mxu0 }
 0x10b   :  { %v249_v14 = vmul.f32 1.442695, %v1188_v8  ;;  %v1193_v15 = vadd.f32 %v207_v9, %v81_v12  ;;  %vm238_vm6 = vcmp.gt.f32.partialorder %v1188_v8, 0.0  ;;  %v331_v9 = vpop.permute.xlu1 %330 }
 0x10c   :  { %v857_v11 = vpop.f32.mrf.mxu0 }
 0x10d   :  { %v229_v13 = vadd.f32 %v857_v11, %v106_v0  ;;  %v245_v25 = vmul.f32 1.442695, %v1193_v15  ;;  %vm236_vm8 = vcmp.gt.f32.partialorder %v1193_v15, 0.0 }
 0x10e   :  { %v220_v16 = vpop.f32.mrf.mxu0 }
 0x10f   :  { %v255_v17 = vmul.f32 1.442695, %v229_v13  ;;  %v221_v18 = vadd.f32 %v220_v16, %v96_v63  ;;  %vm241_vm2 = vcmp.gt.f32.partialorder %v229_v13, 0.0 }
 0x110   :  { %v858_v21 = vpop.f32.mrf.mxu0 }
 0x111   :  { %928 = vpow2.f32 %v255_v17  ;;  %v251_v23 = vmul.f32 1.442695, %v221_v18  ;;  %v232_v24 = vadd.f32 %v858_v21, %v111_v2  ;;  %vm239_vm4 = vcmp.gt.f32.partialorder %v221_v18, 0.0 }
 0x112   :  { %930 = vpow2.f32 %v249_v14  ;;  %v223_v26 = vpop.f32.mrf.mxu0 }
 0x113   :  { %932 = vpow2.f32 %v251_v23  ;;  %v257_v27 = vmul.f32 1.442695, %v232_v24  ;;  %v224_v28 = vadd.f32 %v223_v26, %v101_v1  ;;  %vm242_vm3 = vcmp.gt.f32.partialorder %v232_v24, 0.0 }
 0x114   :  { %934 = vpow2.f32 %v247_v20 }
 0x115   :  { %936 = vpow2.f32 %v257_v27  ;;  %v253_v30 = vmul.f32 1.442695, %v224_v28  ;;  %vm240_vm5 = vcmp.gt.f32.partialorder %v224_v28, 0.0 }
 0x116   :  { %938 = vpow2.f32 %v245_v25 }
 0x117   :  { %940 = vpow2.f32 %v253_v30 }
 0x118   :  { %942 = vpow2.f32 %v243_v29 }
 0x11e   :  { %v929_v31 = vpop.eup %928 }
 0x11f   :  { %v931_v32 = vpop.eup %930  ;;  %v767_v33 = vadd.f32 -1.0, %v929_v31 }
 0x120   :  { %v933_v34 = vpop.eup %932  ;;  %v764_v39 = vadd.f32 -1.0, %v931_v32 }
 0x121   :  { %v935_v35 = vpop.eup %934  ;;  %v765_v36 = vadd.f32 -1.0, %v933_v34  ;;  %v273_v41 = vmul.f32 1.6732632, %v767_v33 }
 0x122   :  { %v937_v37 = vpop.eup %936  ;;  %v763_v43 = vadd.f32 -1.0, %v935_v35  ;;  %v270_v52 = vmul.f32 1.6732632, %v764_v39 }
 0x123   :  { %v939_v38 = vpop.eup %938  ;;  %v768_v40 = vadd.f32 -1.0, %v937_v37  ;;  %v271_v46 = vmul.f32 1.6732632, %v765_v36  ;;  %v281_v49 = vsel %vm241_vm2, %v229_v13, %v273_v41  ;;  %v321_v13 = vpop.permute.xlu1 %320 }
 0x124   :  { %v941_v42 = vpop.eup %940  ;;  %v762_v48 = vadd.f32 -1.0, %v939_v38  ;;  %v269_v57 = vmul.f32 1.6732632, %v763_v43  ;;  %v278_v59 = vsel %vm238_vm6, %v1188_v8, %v270_v52  ;;  %v336_v8 = vpop.permute.xlu0 %335 }
 0x125   :  { %v766_v44 = vadd.f32 -1.0, %v941_v42  ;;  %v274_v45 = vmul.f32 1.6732632, %v768_v40  ;;  %v943_v47 = vpop.eup %942  ;;  %v279_v55 = vsel %vm239_vm4, %v221_v18, %v271_v46 }
 0x126   :  { %v761_v54 = vadd.f32 -1.0, %v943_v47  ;;  %v268_v60 = vmul.f32 1.6732632, %v762_v48  ;;  %v277_v61 = vsel %vm237_vm7, %v1190_v10, %v269_v57 }
 0x127   :  { %v282_v50 = vsel %vm242_vm3, %v232_v24, %v274_v45  ;;  %v272_v51 = vmul.f32 1.6732632, %v766_v44  ;;  %v292_v63 = vpack.c.bf16 %v278_v59, %v277_v61  ;;  %v311_v20 = vpop.permute.xlu1 %310  ;;  %vm978_vm3 = vmmov 0  }
 0x128   :  { %v294_v53 = vpack.c.bf16 %v282_v50, %v281_v49  ;;  %v267_v62 = vmul.f32 1.6732632, %v761_v54  ;;  %v276_v0 = vsel %vm236_vm8, %v1193_v15, %v268_v60  ;;  %v326_v10 = vpop.permute.xlu0 %325 }
 0x129   :  { %v280_v56 = vsel %vm240_vm5, %v224_v28, %v272_v51 }
 0x12a   :  { %859 = vmatprep.subr.bf16.mxu1 %v294_v53  ;;  %v293_v58 = vpack.c.bf16 %v280_v56, %v279_v55  ;;  %v275_v1 = vsel %vm235_vm9, %v1196_v22, %v267_v62 }
 0x12b   :  { %860 = vmatpush3.bf16.msra.mxu1 %v294_v53  ;;  %v291_v2 = vpack.c.bf16 %v276_v0, %v275_v1 }
 0x12c   :  { %861 = vmatprep.subr.bf16.mxu1 %v293_v58  ;;  %v316_v15 = vpop.permute.xlu0 %315 }
 0x12f   :  { %862 = vmatpush3.bf16.msra.mxu1 %v293_v58 }
 0x130   :  { %863 = vmatprep.subr.bf16.mxu1 %v292_v63  ;;  %v306_v27 = vpop.permute.xlu0 %305 }
 0x133   :  { %864 = vmatpush3.bf16.msra.mxu1 %v292_v63 }
 0x134   :  { %865 = vmatprep.subr.bf16.mxu1 %v291_v2 }
 0x137   :  { %866 = vmatpush3.bf16.msra.mxu1 %v291_v2 }
 0x13a   :  { %868 = vmatmul.mubr.msk.bf16.vlgmr.msra.gmra.mxu1 %vm363_vm1, %v921_v3 }
 0x13b   :  { %871 = vmatprep.mubr.msk.bf16.mxu1 %vm363_vm1, %v922_v4 }
 0x142   :  { %872 = vmatmul.mubr.msk.bf16.gmra.mxu1 %vm363_vm1, %v923_v5 }
 0x143   :  { %883 = vmatprep.mubr.msk.bf16.mxu1 %vm363_vm1, %v924_v6 }
 0x1fa   :  { %v869_v11 = vpop.f32.mrf.mxu1 }
 0x1fb   :  { %v1226_v18 = vadd.f32 %v869_v11, %v316_v15  ;;  %v925_v11 = vld [vmem:[%s1290_s5 + $0x8] sm:$0xff]   ;;  %v547_v15 = vpop.permute.xlu1 %546 }
 0x1fc   :  { %v410_v12 = vpop.f32.mrf.mxu1 }
 0x1fd   :  { %v453_v28 = vmul.f32 1.442695, %v1226_v18  ;;  %v1232_v30 = vadd.f32 %v410_v12, %v306_v27  ;;  %vm443_vm15 = vcmp.gt.f32.partialorder %v1226_v18, 0.0  ;;  %v926_v12 = vld [vmem:[%s1290_s5 + $0x10] sm:$0xff]  }
 0x1fe   :  { %v870_v14 = vpop.f32.mrf.mxu1 }
 0x1ff   :  { %v1224_v16 = vadd.f32 %v870_v14, %v321_v13  ;;  %v449_v37 = vmul.f32 1.442695, %v1232_v30  ;;  %vm441_vm2 = vcmp.gt.f32.partialorder %v1232_v30, 0.0  ;;  %v927_v13 = vld [vmem:[%s1290_s5 + $0x18] sm:$0xff]   ;;  %v977_v14 = vmov 0.0  }
 0x200   :  { %v413_v17 = vpop.f32.mrf.mxu1 }
 0x201   :  { %v455_v22 = vmul.f32 1.442695, %v1224_v16  ;;  %v1229_v23 = vadd.f32 %v413_v17, %v311_v20  ;;  %vm444_vm14 = vcmp.gt.f32.partialorder %v1224_v16, 0.0  ;;  %v537_v17 = vpop.permute.xlu1 %536 }
 0x202   :  { %v873_v19 = vpop.f32.mrf.mxu1 }
 0x203   :  { %v435_v21 = vadd.f32 %v873_v19, %v336_v8  ;;  %v451_v33 = vmul.f32 1.442695, %v1229_v23  ;;  %vm442_vm0 = vcmp.gt.f32.partialorder %v1229_v23, 0.0 }
 0x204   :  { %v426_v24 = vpop.f32.mrf.mxu1 }
 0x205   :  { %v461_v25 = vmul.f32 1.442695, %v435_v21  ;;  %v427_v26 = vadd.f32 %v426_v24, %v326_v10  ;;  %vm447_vm10 = vcmp.gt.f32.partialorder %v435_v21, 0.0 }
 0x206   :  { %v874_v29 = vpop.f32.mrf.mxu1 }
 0x207   :  { %944 = vpow2.f32 %v461_v25  ;;  %v457_v31 = vmul.f32 1.442695, %v427_v26  ;;  %v438_v32 = vadd.f32 %v874_v29, %v341_v7  ;;  %vm445_vm12 = vcmp.gt.f32.partialorder %v427_v26, 0.0 }
 0x208   :  { %946 = vpow2.f32 %v455_v22  ;;  %v429_v34 = vpop.f32.mrf.mxu1  ;;  %v527_v22 = vpop.permute.xlu1 %526 }
 0x209   :  { %948 = vpow2.f32 %v457_v31  ;;  %v463_v35 = vmul.f32 1.442695, %v438_v32  ;;  %v430_v36 = vadd.f32 %v429_v34, %v331_v9  ;;  %vm448_vm11 = vcmp.gt.f32.partialorder %v438_v32, 0.0 }
 0x20a   :  { %950 = vpow2.f32 %v453_v28 }
 0x20b   :  { %952 = vpow2.f32 %v463_v35  ;;  %v459_v38 = vmul.f32 1.442695, %v430_v36  ;;  %vm446_vm13 = vcmp.gt.f32.partialorder %v430_v36, 0.0 }
 0x20c   :  { %954 = vpow2.f32 %v451_v33 }
 0x20d   :  { %956 = vpow2.f32 %v459_v38 }
 0x20e   :  { %958 = vpow2.f32 %v449_v37 }
 0x214   :  { %v945_v39 = vpop.eup %944 }
 0x215   :  { %v947_v40 = vpop.eup %946  ;;  %v783_v41 = vadd.f32 -1.0, %v945_v39 }
 0x216   :  { %v949_v42 = vpop.eup %948  ;;  %v780_v47 = vadd.f32 -1.0, %v947_v40 }
 0x217   :  { %v951_v43 = vpop.eup %950  ;;  %v781_v44 = vadd.f32 -1.0, %v949_v42  ;;  %v479_v49 = vmul.f32 1.6732632, %v783_v41 }
 0x218   :  { %v953_v45 = vpop.eup %952  ;;  %v779_v51 = vadd.f32 -1.0, %v951_v43  ;;  %v476_v60 = vmul.f32 1.6732632, %v780_v47 }
 0x219   :  { %v955_v46 = vpop.eup %954  ;;  %v784_v48 = vadd.f32 -1.0, %v953_v45  ;;  %v477_v54 = vmul.f32 1.6732632, %v781_v44  ;;  %v487_v57 = vsel %vm447_vm10, %v435_v21, %v479_v49 }
 0x21a   :  { %v957_v50 = vpop.eup %956  ;;  %v778_v56 = vadd.f32 -1.0, %v955_v46  ;;  %v475_v1 = vmul.f32 1.6732632, %v779_v51  ;;  %v484_v3 = vsel %vm444_vm14, %v1224_v16, %v476_v60  ;;  %v542_v16 = vpop.permute.xlu0 %541 }
 0x21b   :  { %v782_v52 = vadd.f32 -1.0, %v957_v50  ;;  %v480_v53 = vmul.f32 1.6732632, %v784_v48  ;;  %v959_v55 = vpop.eup %958  ;;  %v485_v63 = vsel %vm445_vm12, %v427_v26, %v477_v54 }
 0x21c   :  { %v777_v62 = vadd.f32 -1.0, %v959_v55  ;;  %v474_v4 = vmul.f32 1.6732632, %v778_v56  ;;  %v483_v5 = vsel %vm443_vm15, %v1226_v18, %v475_v1 }
 0x21d   :  { %v488_v58 = vsel %vm448_vm11, %v438_v32, %v480_v53  ;;  %v478_v59 = vmul.f32 1.6732632, %v782_v52  ;;  %v498_v7 = vpack.c.bf16 %v484_v3, %v483_v5  ;;  %v517_v32 = vpop.permute.xlu1 %516 }
 0x21e   :  { %v500_v61 = vpack.c.bf16 %v488_v58, %v487_v57  ;;  %v473_v6 = vmul.f32 1.6732632, %v777_v62  ;;  %v482_v8 = vsel %vm442_vm0, %v1229_v23, %v474_v4  ;;  %v532_v19 = vpop.permute.xlu0 %531 }
 0x21f   :  { %v486_v0 = vsel %vm446_vm13, %v430_v36, %v478_v59 }
 0x220   :  { %875 = vmatprep.subr.bf16.mxu1 %v500_v61  ;;  %v499_v2 = vpack.c.bf16 %v486_v0, %v485_v63  ;;  %v481_v9 = vsel %vm441_vm2, %v1232_v30, %v473_v6 }
 0x221   :  { %876 = vmatpush3.bf16.msra.mxu1 %v500_v61  ;;  %v497_v10 = vpack.c.bf16 %v482_v8, %v481_v9 }
 0x222   :  { %877 = vmatprep.subr.bf16.mxu1 %v499_v2  ;;  %v522_v24 = vpop.permute.xlu0 %521 }
 0x225   :  { %878 = vmatpush3.bf16.msra.mxu1 %v499_v2 }
 0x226   :  { %879 = vmatprep.subr.bf16.mxu1 %v498_v7  ;;  %v512_v38 = vpop.permute.xlu0 %511 }
 0x229   :  { %880 = vmatpush3.bf16.msra.mxu1 %v498_v7 }
 0x22a   :  { %881 = vmatprep.subr.bf16.mxu1 %v497_v10 }
 0x22d   :  { %882 = vmatpush3.bf16.msra.mxu1 %v497_v10 }
 0x22e   :  { %891 = vmatprep.subr.bf16.mxu1 %v977_v14 }
 0x230   :  { %884 = vmatmul.mubr.msk.bf16.vlgmr.msra.gmra.mxu1 %vm363_vm1, %v925_v11 }
 0x231   :  { %887 = vmatprep.mubr.msk.bf16.mxu1 %vm363_vm1, %v926_v12 }
 0x238   :  { %888 = vmatmul.mubr.msk.bf16.gmra.mxu1 %vm363_vm1, %v927_v13 }
 0x239   :  { %899 = vmatprep.mubr.msk.bf16.mxu1 %vm978_vm3, %v977_v14 }
 0x2f0   :  { %v885_v18 = vpop.f32.mrf.mxu1 }
 0x2f1   :  { %v1260_v28 = vadd.f32 %v885_v18, %v522_v24 }
 0x2f2   :  { %v615_v20 = vpop.f32.mrf.mxu1 }
 0x2f3   :  { %v658_v39 = vmul.f32 1.442695, %v1260_v28  ;;  %v616_v41 = vadd.f32 %v615_v20, %v512_v38  ;;  %vm648_vm9 = vcmp.gt.f32.partialorder %v1260_v28, 0.0  ;;  %v694_v20 = vld [vmem:[%s1291_s7] sm:$0xf] }
 0x2f4   :  { %v886_v21 = vpop.f32.mrf.mxu1 }
 0x2f5   :  { %v1258_v25 = vadd.f32 %v886_v21, %v527_v22  ;;  %v654_v46 = vmul.f32 1.442695, %v616_v41  ;;  %vm646_vm11 = vcmp.gt.f32.partialorder %v616_v41, 0.0  ;;  %v703_v21 = vpop.permute.xlu0 %702 }
 0x2f6   :  { %v618_v23 = vpop.f32.mrf.mxu1 }
 0x2f7   :  { %v660_v33 = vmul.f32 1.442695, %v1258_v25  ;;  %v1263_v35 = vadd.f32 %v618_v23, %v517_v32  ;;  %vm649_vm8 = vcmp.gt.f32.partialorder %v1258_v25, 0.0 }
 0x2f8   :  { %v889_v26 = vpop.f32.mrf.mxu1 }
 0x2f9   :  { %v640_v27 = vadd.f32 %v889_v26, %v542_v16  ;;  %v656_v44 = vmul.f32 1.442695, %v1263_v35  ;;  %vm647_vm10 = vcmp.gt.f32.partialorder %v1263_v35, 0.0 }
 0x2fa   :  { %v631_v29 = vpop.f32.mrf.mxu1 }
 0x2fb   :  { %v666_v30 = vmul.f32 1.442695, %v640_v27  ;;  %v632_v31 = vadd.f32 %v631_v29, %v532_v19  ;;  %vm652_vm4 = vcmp.gt.f32.partialorder %v640_v27, 0.0 }
 0x2fc   :  { %v890_v34 = vpop.f32.mrf.mxu1 }
 0x2fd   :  { %960 = vpow2.f32 %v666_v30  ;;  %v662_v36 = vmul.f32 1.442695, %v632_v31  ;;  %v643_v37 = vadd.f32 %v890_v34, %v547_v15  ;;  %vm650_vm7 = vcmp.gt.f32.partialorder %v632_v31, 0.0 }
 0x2fe   :  { %v634_v40 = vpop.f32.mrf.mxu1 }
 0x2ff   :  { %962 = vpow2.f32 %v662_v36  ;;  %v668_v42 = vmul.f32 1.442695, %v643_v37  ;;  %v635_v43 = vadd.f32 %v634_v40, %v537_v17  ;;  %vm653_vm5 = vcmp.gt.f32.partialorder %v643_v37, 0.0 }
 0x300   :  { %964 = vpow2.f32 %v660_v33 }
 0x301   :  { %966 = vpow2.f32 %v668_v42  ;;  %v664_v45 = vmul.f32 1.442695, %v635_v43  ;;  %vm651_vm6 = vcmp.gt.f32.partialorder %v635_v43, 0.0 }
 0x302   :  { %968 = vpow2.f32 %v658_v39 }
 0x303   :  { %970 = vpow2.f32 %v664_v45 }
 0x304   :  { %972 = vpow2.f32 %v656_v44 }
 0x305   :  { %974 = vpow2.f32 %v654_v46 }
 0x30a   :  { %v961_v47 = vpop.eup %960 }
 0x30b   :  { %v799_v48 = vadd.f32 -1.0, %v961_v47 }
 0x30c   :  { %v963_v49 = vpop.eup %962 }
 0x30d   :  { %v965_v50 = vpop.eup %964  ;;  %v684_v53 = vmul.f32 1.6732632, %v799_v48  ;;  %v797_v54 = vadd.f32 -1.0, %v963_v49 }
 0x30e   :  { %v967_v51 = vpop.eup %966  ;;  %v796_v57 = vadd.f32 -1.0, %v965_v50 }
 0x30f   :  { %v969_v52 = vpop.eup %968  ;;  %v800_v55 = vadd.f32 -1.0, %v967_v51  ;;  %v692_v62 = vsel %vm652_vm4, %v640_v27, %v684_v53  ;;  %v682_v63 = vmul.f32 1.6732632, %v797_v54 }
 0x310   :  { %v971_v56 = vpop.eup %970  ;;  %v795_v61 = vadd.f32 -1.0, %v969_v52  ;;  %v681_v4 = vmul.f32 1.6732632, %v796_v57 }
 0x311   :  { %v685_v58 = vmul.f32 1.6732632, %v800_v55  ;;  %v798_v59 = vadd.f32 -1.0, %v971_v56  ;;  %v973_v60 = vpop.eup %972  ;;  %v690_v9 = vsel %vm650_vm7, %v632_v31, %v682_v63 }
 0x312   :  { %v975_v2 = vpop.eup %974  ;;  %v794_v5 = vadd.f32 -1.0, %v973_v60  ;;  %v680_v7 = vmul.f32 1.6732632, %v795_v61  ;;  %v689_v11 = vsel %vm649_vm8, %v1258_v25, %v681_v4 }
 0x313   :  { %v693_v0 = vsel %vm653_vm5, %v643_v37, %v685_v58  ;;  %v683_v1 = vmul.f32 1.6732632, %v798_v59  ;;  %v793_v8 = vadd.f32 -1.0, %v975_v2 }
 0x314   :  { %v698_v3 = vpack.c.bf16 %v693_v0, %v692_v62  ;;  %v679_v12 = vmul.f32 1.6732632, %v794_v5  ;;  %v688_v13 = vsel %vm648_vm9, %v1260_v28, %v680_v7 }
 0x315   :  { %v691_v6 = vsel %vm651_vm6, %v635_v43, %v683_v1  ;;  %v678_v15 = vmul.f32 1.6732632, %v793_v8  ;;  %v696_v16 = vpack.c.bf16 %v689_v11, %v688_v13 }
 0x316   :  { %892 = vmatpush3.bf16.msra.mxu1 %v698_v3  ;;  %v697_v10 = vpack.c.bf16 %v691_v6, %v690_v9  ;;  %v687_v17 = vsel %vm647_vm10, %v1263_v35, %v679_v12 }
 0x317   :  { %893 = vmatprep.subr.bf16.mxu1 %v977_v14  ;;  %v686_v18 = vsel %vm646_vm11, %v616_v41, %v678_v15 }
 0x318   :  { %v695_v19 = vpack.c.bf16 %v687_v17, %v686_v18 }
 0x31a   :  { %894 = vmatpush3.bf16.msra.mxu1 %v697_v10 }
 0x31b   :  { %895 = vmatprep.subr.bf16.mxu1 %v977_v14 }
 0x31e   :  { %896 = vmatpush3.bf16.msra.mxu1 %v696_v16 }
 0x31f   :  { %897 = vmatprep.subr.bf16.mxu1 %v977_v14 }
 0x322   :  { %898 = vmatpush3.bf16.msra.mxu1 %v695_v19 }
 0x325   :  { %900 = vmatmul.mubr.msk.bf16.vlgmr.msra.gmra.mxu1 %vm363_vm1, %v694_v20 }
 0x3e5   :  { %v742_v22 = vpop.f32.mrf.mxu1 }
 0x3e6   :  { %v743_v23 = vadd.f32 %v742_v22, %v703_v21 }
 0x3e7   :  { %v901_v24 = vpop.f32.mrf.mxu1 }
 0x3e8   :  { %748 = vst [vmem:[%s1292_s9] sm:$0xff] %v743_v23 }
 0x3e9   :  { %v745_v25 = vpop.f32.mrf.mxu1 }
 0x3eb   :  { %v902_v26 = vpop.f32.mrf.mxu1 }

</bundles_post_ra>
